<compile_context>
chip_gen: v7x
topology: tpu7x:2x2x1
jax: 0.10.0
libtpu: 0.0.40
codegen_flags: <defaults>
</compile_context>

<pallas_src>
import jax
import jax.numpy as jnp
from jax.experimental import pallas as pl
from jax.experimental.pallas import tpu as pltpu

_LANE = 128
_ROW_ALIGN = 16           # bf16 output tile packs 16 rows per sublane tile
_MIN_ROWS_PER_SPLIT = 128  # only force a 2-way grid split if each step gets >= this


def _round_up(a, m):
    return ((a + m - 1) // m) * m


def _cdiv(a, b):
    return (a + b - 1) // b


def _linear_kernel(x_ref, w_ref, b_ref, o_ref):
    # x_ref: (TB, H) f32   w_ref: (H, Lp) bf16   b_ref: (1, Lp) f32
    # o_ref: (TB, Lp) bf16
    x_bf = x_ref[...].astype(jnp.bfloat16)          # in-kernel cast (free VPU slots)
    acc = jnp.dot(x_bf, w_ref[...], preferred_element_type=jnp.float32)
    o_ref[...] = (acc + b_ref[...]).astype(o_ref.dtype)


def prepare_classifier_params(weight, bias):
    """weight: (L, H) f32 (PyTorch layout), bias: (L,) f32.

    Returns (w_bf, b_pad, L): lane-padded bf16 transposed weight (H, Lp) and
    f32 bias row (1, Lp). Do this once (or under jit with constant params).
    """
    L, H = weight.shape
    assert bias.shape == (L,)
    Lp = _round_up(max(L, _LANE), _LANE)
    w_pad = jnp.zeros((H, Lp), jnp.float32).at[:, :L].set(
        weight.T.astype(jnp.float32))
    b_pad = jnp.zeros((1, Lp), jnp.float32).at[:, :L].set(
        bias.reshape(1, L).astype(jnp.float32))
    return w_pad.astype(jnp.bfloat16), b_pad, L


def _choose_tiling(B, tb):
    """Pick (tb_eff, Bp, n_steps) with bounded padding and >=2 steps for big B."""
    n_steps = max(1, _cdiv(B, tb))
    # v7x has 2 TensorCores; keep at least 2 parallel grid steps when there is
    # enough work for both (no measurable cost on the 1-TC v5e/v6e).
    if n_steps == 1 and B >= 2 * _MIN_ROWS_PER_SPLIT:
        n_steps = 2
    tb_eff = _round_up(_cdiv(B, n_steps), _ROW_ALIGN)
    Bp = n_steps * tb_eff
    return tb_eff, Bp, n_steps


def emotion_classifier_forward(x, w_bf, b_pad, num_labels, *, tb=2048):
    """x: (B, H) f32, w_bf: (H, Lp) bf16, b_pad: (1, Lp) f32 -> (B, num_labels) f32."""
    B, H = x.shape
    Hw, Lp = w_bf.shape
    assert H == Hw and b_pad.shape == (1, Lp)

    tb_eff, Bp, n_steps = _choose_tiling(B, tb)
    if Bp != B:
        x = jnp.pad(x, ((0, Bp - B), (0, 0)))
    grid = (n_steps,)

    cost = pl.CostEstimate(
        flops=2 * B * H * num_labels,               # real labels, not padded
        transcendentals=0,
        bytes_accessed=(Bp * H * 4)                 # f32 x read
        + (H * Lp * 2)                              # bf16 weight (resident)
        + (Lp * 4)                                  # f32 bias row
        + (Bp * Lp * 2),                            # bf16 logits writeback
    )

    out = pl.pallas_call(
        _linear_kernel,
        out_shape=jax.ShapeDtypeStruct((Bp, Lp), jnp.bfloat16),
        grid_spec=pltpu.PrefetchScalarGridSpec(
            num_scalar_prefetch=0,
            grid=grid,
            in_specs=[
                pl.BlockSpec((tb_eff, H), lambda i: (i, 0)),  # batch tile of x (f32)
                pl.BlockSpec((H, Lp), lambda i: (0, 0)),      # full weight, resident
                pl.BlockSpec((1, Lp), lambda i: (0, 0)),      # bias row, resident
            ],
            out_specs=pl.BlockSpec((tb_eff, Lp), lambda i: (i, 0)),
        ),
        compiler_params=pltpu.CompilerParams(
            dimension_semantics=("parallel",),
            vmem_limit_bytes=48 << 20,  # fits tb<=4096 f32 x tiles; safe on v7x 64 MiB
        ),
        cost_estimate=cost,
    )(x, w_bf, b_pad)

    # Slice back to the real logits and restore the module's f32 contract.
    # (Tiny: num_labels columns only.)
    return out[:B, :num_labels].astype(jnp.float32)


if __name__ == "__main__":
    hidden_size = 768
    num_labels = 6

    key = jax.random.PRNGKey(0)
    k_x, k_w, k_b = jax.random.split(key, 3)

    # Deterministic synthetic parameters (nn.Linear(768, 6) shapes, PyTorch layout).
    weight = jax.random.normal(k_w, (num_labels, hidden_size), jnp.float32) * 0.02
    bias = jax.random.normal(k_b, (num_labels,), jnp.float32) * 0.02

    # One-time parameter preparation (padding + bf16 cast hoisted out of the call path).
    w_bf, b_pad, L = prepare_classifier_params(weight, bias)
    weight_t = weight.T  # (hidden, num_labels) reference layout

    def check(batch):
        x = jax.random.normal(
            jax.random.fold_in(k_x, batch), (batch, hidden_size), jnp.float32
        )
        out = jax.block_until_ready(
            emotion_classifier_forward(x, w_bf, b_pad, num_labels)
        )
        assert out.shape == (batch, num_labels)
        assert out.dtype == jnp.float32

        # Reference matching the kernel's bf16-input / f32-accumulate / bf16-out math.
        xq = x.astype(jnp.bfloat16).astype(jnp.float32)
        wq = weight_t.astype(jnp.bfloat16).astype(jnp.float32)
        ref = jnp.dot(xq, wq, precision=jax.lax.Precision.HIGHEST) + bias
        err = float(jnp.max(jnp.abs(out - ref)))
        assert jnp.allclose(out, ref, atol=1e-2, rtol=1e-2), err

        # Loose semantic check against full-f32 PyTorch Linear math.
        # (bf16 inputs/outputs are an intentional contract for classification logits.)
        ref_f32 = jnp.dot(x, weight_t, precision=jax.lax.Precision.HIGHEST) + bias
        assert jnp.allclose(out, ref_f32, atol=5e-2, rtol=5e-2)

    check(8)    # single small block (matches original demo batch)
    check(37)   # B not a multiple of 16: exercises batch padding + row slicing
    check(300)  # B >= 256: exercises the >=2-step (v7x dual-TensorCore) path

    print("KERNEL_OK")
</pallas_src>

<mosaic_0001>
module attributes {stable_mosaic.version = 11 : i64} {
  func.func @_linear_kernel(%arg0: i32, %arg1: memref<16x768xf32, #tpu.memory_space<vmem>>, %arg2: memref<768x128xbf16, #tpu.memory_space<vmem>>, %arg3: memref<1x128xf32, #tpu.memory_space<vmem>>, %arg4: memref<16x128xbf16, #tpu.memory_space<vmem>>) attributes {dimension_semantics = [#tpu.dimension_semantics<parallel>], iteration_bounds = array<i64: 1>, scalar_prefetch = 0 : i64, scratch_operands = 0 : i64, tpu.core_type = #tpu.core_type<tc>, window_params = [{transform_indices = @transform_0, window_bounds = array<i64: 16, 768>}, {pipeline_mode = #tpu.pipeline_mode<synchronous>, transform_indices = @transform_1, window_bounds = array<i64: 768, 128>}, {pipeline_mode = #tpu.pipeline_mode<synchronous>, transform_indices = @transform_2, window_bounds = array<i64: 1, 128>}, {transform_indices = @transform_3, window_bounds = array<i64: 16, 128>}]} {
    %c0 = arith.constant 0 : index
    %c0_0 = arith.constant 0 : index
    %0 = vector.load %arg1[%c0, %c0_0] : memref<16x768xf32, #tpu.memory_space<vmem>>, vector<16x768xf32>
    %1 = arith.truncf %0 : vector<16x768xf32> to vector<16x768xbf16>
    %c0_1 = arith.constant 0 : index
    %c0_2 = arith.constant 0 : index
    %2 = vector.load %arg2[%c0_1, %c0_2] : memref<768x128xbf16, #tpu.memory_space<vmem>>, vector<768x128xbf16>
    %cst = arith.constant dense<0.000000e+00> : vector<16x128xf32>
    %3 = tpu.matmul %1, %2, %cst {dimension_numbers = #tpu.dot_dimension_numbers<[1], [0], [0], [1], [0, 0, 1, 1], [], []>} : vector<16x768xbf16>, vector<768x128xbf16>, vector<16x128xf32> -> vector<16x128xf32>
    %c0_3 = arith.constant 0 : index
    %c0_4 = arith.constant 0 : index
    %4 = vector.load %arg3[%c0_3, %c0_4] : memref<1x128xf32, #tpu.memory_space<vmem>>, vector<1x128xf32>
    %5 = vector.broadcast %4 : vector<1x128xf32> to vector<16x128xf32>
    %6 = arith.addf %3, %5 : vector<16x128xf32>
    %7 = arith.truncf %6 : vector<16x128xf32> to vector<16x128xbf16>
    %c0_5 = arith.constant 0 : index
    %c0_6 = arith.constant 0 : index
    %8 = vector.load %arg4[%c0_5, %c0_6] : memref<16x128xbf16, #tpu.memory_space<vmem>>, vector<16x128xbf16>
    tpu.vector_store %arg4[%c0_5, %c0_6], %7 {strides = array<i32>} : memref<16x128xbf16, #tpu.memory_space<vmem>>, vector<16x128xbf16>,
    return
  }
  func.func @transform_0(%arg0: i32) -> (i32, i32) {
    %c0_i32 = arith.constant 0 : i32
    %c0_i32_0 = arith.constant 0 : i32
    return %arg0, %c0_i32 : i32, i32
  }
  func.func @transform_1(%arg0: i32) -> (i32, i32) {
    %c0_i32 = arith.constant 0 : i32
    %c0_i32_0 = arith.constant 0 : i32
    %c0_i32_1 = arith.constant 0 : i32
    return %c0_i32, %c0_i32_0 : i32, i32
  }
  func.func @transform_2(%arg0: i32) -> (i32, i32) {
    %c0_i32 = arith.constant 0 : i32
    %c0_i32_0 = arith.constant 0 : i32
    %c0_i32_1 = arith.constant 0 : i32
    return %c0_i32, %c0_i32_0 : i32, i32
  }
  func.func @transform_3(%arg0: i32) -> (i32, i32) {
    %c0_i32 = arith.constant 0 : i32
    %c0_i32_0 = arith.constant 0 : i32
    return %arg0, %c0_i32 : i32, i32
  }
}

</mosaic_0001>

<bundles_post_ra>
// kernel: tpu_custom_call.1
= control target key start
LH: loop header
LB: loop body
LE: loop exit
PB: predicated region body
PF: predicated region fallthrough
CT: control target
= control target key end

     0   :  { %8 = vsyncpa [#allocation3], 0  ;;  %s927_s0 = inlined_call_operand.hbm [shape: f32[16,768], index: 0, kind: input, shape index: {}]   ;;  %s928_s1 = inlined_call_operand.hbm [shape: bf16[768,128], index: 1, kind: input, shape index: {}]   ;;  %s929_s2 = inlined_call_operand.vmem [shape: f32[1,128], index: 2, kind: input, shape index: {}]   ;;  %s930_s3 = inlined_call_operand.hbm [shape: bf16[16,128], index: 3, kind: output, shape index: {}]  }
   0x1   :  { %9 = vsyncpa [#allocation6], 0 }
   0x2   :  { %10 = vsyncpa [#allocation4], 0  ;;  %s855_s12 = smov [#allocation2]   ;;  %s783_s16 = scalar_lea.hbm %s927_s0, 1536 }
   0x3   :  { %s16_s13 = sshll.u32 %s855_s12, 4  ;;  %p784_p0 = scmp.ne.s32.totalorder %s927_s0, %s783_s16  ;;  %s17_s13 = int_to_ptr.vmem [resolvable:$true] %s16_s13 }
   0x4   :  { %p787_p1 = scmp.lt.u32.totalorder %s783_s16, %s927_s0 }
   0x6   :  { %p789_p2 = pnand %p787_p1, %p784_p0 }
   0x8   :  { %792 = shalt.err (!%p789_p2)
}
   0x9   :  { %s793_s21 = scalar_lea.vmem %s17_s13, 1536  ;;  %p798_p4 = scmp.lt.s32.totalorder %s17_s13, %s17_s13 }
   0xa   :  { %p794_p3 = scmp.ne.s32.totalorder %s17_s13, %s793_s21  ;;  %p799_p5 = scmp.lt.s32.totalorder %s793_s21, %s793_s21 }
   0xc   :  { %p800_p6 = por %p799_p5, %p798_p4 }
   0xe   :  { %p801_p7 = pnand %p800_p6, %p794_p3 }
  0x10   :  { %804 = shalt.err (!%p801_p7)
}
  0x11   :  { %s856_s22 = smov 768   ;;  %s857_s23 = smov 48  }
  0x12   :  { %22 = dma.hbm_to_vmem [thread:$0]  %s927_s0, 1536, %s17_s13, [#allocation3], %s856_s22, %s856_s22, %s857_s23  }
  0x13   :  { %s858_s26 = smov [#allocation5]   ;;  %s805_s30 = scalar_lea.hbm %s928_s1, 6144 }
  0x14   :  { %s28_s27 = sshll.u32 %s858_s26, 4  ;;  %p806_p8 = scmp.ne.s32.totalorder %s928_s1, %s805_s30  ;;  %s29_s27 = int_to_ptr.vmem [resolvable:$true] %s28_s27 }
  0x15   :  { %p809_p9 = scmp.lt.u32.totalorder %s805_s30, %s928_s1 }
  0x17   :  { %p811_p10 = pnand %p809_p9, %p806_p8 }
  0x19   :  { %814 = shalt.err (!%p811_p10)
}
  0x1a   :  { %s815_s8 = scalar_lea.vmem %s29_s27, 6144  ;;  %p820_p12 = scmp.lt.s32.totalorder %s29_s27, %s29_s27 }
  0x1b   :  { %p816_p11 = scmp.ne.s32.totalorder %s29_s27, %s815_s8  ;;  %p821_p13 = scmp.lt.s32.totalorder %s815_s8, %s815_s8 }
  0x1d   :  { %p822_p0 = por %p821_p13, %p820_p12 }
  0x1f   :  { %p823_p1 = pnand %p822_p0, %p816_p11 }
  0x21   :  { %826 = shalt.err (!%p823_p1)
}
  0x22   :  { %s859_s0 = smov 64   ;;  %s860_s9 = smov 4  }
  0x23   :  { %34 = dma.hbm_to_vmem [thread:$0]  %s928_s1, 6144, %s29_s27, [#allocation6], %s859_s0, %s859_s0, %s860_s9  }
  0x24   :  { %849 = dma.done.wait [#allocation3], 1536  }
  0x25   :  { %850 = vsyncadd [#allocation3], 4294965760 }
  0x26   :  { %851 = dma.done.wait [#allocation6], 6144  }
  0x27   :  { %852 = vsyncadd [#allocation6], 4294961152  ;;  %v735_v0 = vld [vmem:[#allocation5 + $0x40] sm:$0xff]   ;;  %v739_v4 = vld [vmem:[#allocation5 + $0x48] sm:$0xff]  }
  0x28   :  { %v736_v1 = vld [vmem:[#allocation5] sm:$0xff]   ;;  %662 = vmatprep.subr.bf16.mxu0 %v735_v0  ;;  %v740_v5 = vld [vmem:[#allocation5 + $0x8] sm:$0xff]   ;;  %v743_v8 = vld [vmem:[#allocation5 + $0x50] sm:$0xff]  }
  0x29   :  { %v737_v2 = vld [vmem:[#allocation5 + $0xc0] sm:$0xff]   ;;  %663 = vmatpush3.bf16.msra.mxu0 %v736_v1  ;;  %v741_v6 = vld [vmem:[#allocation5 + $0xc8] sm:$0xff]   ;;  %v744_v9 = vld [vmem:[#allocation5 + $0x10] sm:$0xff]  }
  0x2a   :  { %v738_v3 = vld [vmem:[#allocation5 + $0x80] sm:$0xff]   ;;  %684 = vmatprep.subr.bf16.mxu1 %v737_v2  ;;  %664 = vmatprep.subr.bf16.mxu0 %v739_v4  ;;  %v742_v7 = vld [vmem:[#allocation5 + $0x88] sm:$0xff]   ;;  %v745_v10 = vld [vmem:[#allocation5 + $0xd0] sm:$0xff]  }
  0x2b   :  { %685 = vmatpush3.bf16.msra.mxu1 %v738_v3  ;;  %v746_v11 = vld [vmem:[#allocation5 + $0x90] sm:$0xff]   ;;  %v747_v12 = vld [vmem:[#allocation5 + $0x58] sm:$0xff]   ;;  %v751_v16 = vld [vmem:[#allocation5 + $0x60] sm:$0xff]  }
  0x2c   :  { %686 = vmatprep.subr.bf16.mxu1 %v741_v6  ;;  %v748_v13 = vld [vmem:[#allocation5 + $0x18] sm:$0xff]   ;;  %v752_v17 = vld [vmem:[#allocation5 + $0x20] sm:$0xff]   ;;  %v755_v20 = vld [vmem:[#allocation5 + $0x68] sm:$0xff]  }
  0x2d   :  { %665 = vmatpush3.bf16.msra.mxu0 %v740_v5  ;;  %v749_v14 = vld [vmem:[#allocation5 + $0xd8] sm:$0xff]   ;;  %v753_v18 = vld [vmem:[#allocation5 + $0xe0] sm:$0xff]   ;;  %v756_v21 = vld [vmem:[#allocation5 + $0x28] sm:$0xff]  }
  0x2e   :  { %666 = vmatprep.subr.bf16.mxu0 %v743_v8  ;;  %v750_v15 = vld [vmem:[#allocation5 + $0x98] sm:$0xff]   ;;  %v754_v19 = vld [vmem:[#allocation5 + $0xa0] sm:$0xff]   ;;  %v757_v22 = vld [vmem:[#allocation5 + $0xe8] sm:$0xff]  }
  0x2f   :  { %687 = vmatpush3.bf16.msra.mxu1 %v742_v7  ;;  %v758_v23 = vld [vmem:[#allocation5 + $0xa8] sm:$0xff]   ;;  %v759_v24 = vld [vmem:[#allocation5 + $0x70] sm:$0xff]   ;;  %v763_v28 = vld [vmem:[#allocation5 + $0x78] sm:$0xff]  }
  0x30   :  { %688 = vmatprep.subr.bf16.mxu1 %v745_v10  ;;  %v760_v25 = vld [vmem:[#allocation5 + $0x30] sm:$0xff]   ;;  %v764_v29 = vld [vmem:[#allocation5 + $0x38] sm:$0xff]   ;;  %v45_v31 = vld [vmem:[#allocation2 + $0x8] sm:$0xff] }
  0x31   :  { %667 = vmatpush3.bf16.msra.mxu0 %v744_v9  ;;  %v761_v26 = vld [vmem:[#allocation5 + $0xf0] sm:$0xff]   ;;  %v765_v30 = vld [vmem:[#allocation5 + $0xf8] sm:$0xff]   ;;  %v44_v35 = vld [vmem:[#allocation2] sm:$0xff] }
  0x32   :  { %668 = vmatprep.subr.bf16.mxu0 %v747_v12  ;;  %v762_v27 = vld [vmem:[#allocation5 + $0xb0] sm:$0xff]   ;;  %v51_v32 = vld [vmem:[#allocation2 + $0x38] sm:$0xff]  ;;  %v767_v38 = vld [vmem:[#allocation5 + $0x140] sm:$0xff]  }
  0x33   :  { %689 = vmatpush3.bf16.msra.mxu1 %v746_v11  ;;  %v57_v33 = vpack.c.bf16 %v51_v32, %v45_v31  ;;  %v766_v34 = vld [vmem:[#allocation5 + $0xb8] sm:$0xff]   ;;  %v50_v36 = vld [vmem:[#allocation2 + $0x30] sm:$0xff]  ;;  %v53_v40 = vld [vmem:[#allocation2 + $0x48] sm:$0xff] }
  0x34   :  { %690 = vmatprep.subr.bf16.mxu1 %v749_v14  ;;  %v56_v37 = vpack.c.bf16 %v50_v36, %v44_v35  ;;  %v47_v39 = vld [vmem:[#allocation2 + $0x18] sm:$0xff]  ;;  %v768_v42 = vld [vmem:[#allocation5 + $0x100] sm:$0xff]   ;;  %v46_v43 = vld [vmem:[#allocation2 + $0x10] sm:$0xff] }
  0x35   :  { %669 = vmatpush3.bf16.msra.mxu0 %v748_v13  ;;  %485 = vmatprep.mubr.bf16.mxu0 %v57_v33  ;;  %v59_v41 = vpack.c.bf16 %v53_v40, %v47_v39  ;;  %v52_v44 = vld [vmem:[#allocation2 + $0x40] sm:$0xff]  ;;  %v769_v46 = vld [vmem:[#allocation5 + $0x148] sm:$0xff]   ;;  %v771_v48 = vld [vmem:[#allocation5 + $0x150] sm:$0xff]  }
  0x36   :  { %670 = vmatprep.subr.bf16.mxu0 %v751_v16  ;;  %v58_v45 = vpack.c.bf16 %v52_v44, %v46_v43  ;;  %v770_v47 = vld [vmem:[#allocation5 + $0x108] sm:$0xff]   ;;  %v772_v49 = vld [vmem:[#allocation5 + $0x110] sm:$0xff]   ;;  %v773_v50 = vld [vmem:[#allocation5 + $0x158] sm:$0xff]  }
  0x37   :  { %691 = vmatpush3.bf16.msra.mxu1 %v750_v15  ;;  %526 = vmatprep.mubr.bf16.mxu1 %v59_v41  ;;  %v774_v51 = vld [vmem:[#allocation5 + $0x118] sm:$0xff]   ;;  %v775_v52 = vld [vmem:[#allocation5 + $0x160] sm:$0xff]   ;;  %v777_v54 = vld [vmem:[#allocation5 + $0x168] sm:$0xff]  }
  0x38   :  { %692 = vmatprep.subr.bf16.mxu1 %v753_v18  ;;  %v776_v53 = vld [vmem:[#allocation5 + $0x120] sm:$0xff]   ;;  %v49_v55 = vld [vmem:[#allocation2 + $0x28] sm:$0xff]  ;;  %v55_v56 = vld [vmem:[#allocation2 + $0x58] sm:$0xff] }
  0x39   :  { %671 = vmatpush3.bf16.msra.mxu0 %v752_v17  ;;  %v61_v57 = vpack.c.bf16 %v55_v56, %v49_v55  ;;  %v778_v58 = vld [vmem:[#allocation5 + $0x128] sm:$0xff]   ;;  %v779_v59 = vld [vmem:[#allocation5 + $0x170] sm:$0xff]   ;;  %v781_v61 = vld [vmem:[#allocation5 + $0x178] sm:$0xff]  }
  0x3a   :  { %672 = vmatprep.subr.bf16.mxu0 %v755_v20  ;;  %v780_v60 = vld [vmem:[#allocation5 + $0x130] sm:$0xff]   ;;  %v782_v62 = vld [vmem:[#allocation5 + $0x138] sm:$0xff]   ;;  %v48_v63 = vld [vmem:[#allocation2 + $0x20] sm:$0xff] }
  0x3b   :  { %693 = vmatpush3.bf16.msra.mxu1 %v754_v19  ;;  %v54_v0 = vld [vmem:[#allocation2 + $0x50] sm:$0xff]  ;;  %v604_v3 = vld [vmem:[%s929_s2] ss:$0 sm:$0xff]  ;;  %s861_s2 = smov [#allocation7]  }
  0x3c   :  { %694 = vmatprep.subr.bf16.mxu1 %v757_v22  ;;  %v60_v1 = vpack.c.bf16 %v54_v0, %v48_v63  ;;  %s591_s13 = sshll.u32 %s861_s2, 4  ;;  %s592_s13 = int_to_ptr.vmem [resolvable:$true] %s591_s13 }
  0x3d   :  { %673 = vmatpush3.bf16.msra.mxu0 %v756_v21  ;;  %s827_s14 = scalar_lea.vmem %s592_s13, 128  ;;  %p832_p3 = scmp.lt.s32.totalorder %s592_s13, %s592_s13 }
  0x3e   :  { %674 = vmatprep.subr.bf16.mxu0 %v759_v24  ;;  %p828_p2 = scmp.ne.s32.totalorder %s592_s13, %s827_s14  ;;  %p833_p4 = scmp.lt.s32.totalorder %s827_s14, %s827_s14 }
  0x3f   :  { %695 = vmatpush3.bf16.msra.mxu1 %v758_v23 }
  0x40   :  { %696 = vmatprep.subr.bf16.mxu1 %v761_v26  ;;  %p834_p5 = por %p833_p4, %p832_p3 }
  0x41   :  { %675 = vmatpush3.bf16.msra.mxu0 %v760_v25 }
  0x42   :  { %676 = vmatprep.subr.bf16.mxu0 %v763_v28  ;;  %p835_p6 = pnand %p834_p5, %p828_p2 }
  0x43   :  { %697 = vmatpush3.bf16.msra.mxu1 %v762_v27 }
  0x44   :  { %698 = vmatprep.subr.bf16.mxu1 %v765_v30 }
  0x45   :  { %677 = vmatpush3.bf16.msra.mxu0 %v764_v29 }
  0x46   :  { %706 = vmatprep.subr.bf16.mxu0 %v767_v38 }
  0x47   :  { %699 = vmatpush3.bf16.msra.mxu1 %v766_v34 }
  0x48   :  { %486 = vmatmul.mubr.bf16.vlgmr.msra.gmra.mrb[0].mxu0 %v56_v37 }
  0x49   :  { %707 = vmatpush3.bf16.msra.mxu0 %v768_v42  ;;  %567 = vmatprep.mubr.bf16.mxu0 %v61_v57 }
  0x4a   :  { %527 = vmatmul.mubr.bf16.vlgmr.msra.gmra.mrb[0].mxu1 %v58_v45  ;;  %708 = vmatprep.subr.bf16.mxu0 %v769_v46 }
  0x4d   :  { %709 = vmatpush3.bf16.msra.mxu0 %v770_v47 }
  0x4e   :  { %710 = vmatprep.subr.bf16.mxu0 %v771_v48 }
  0x51   :  { %711 = vmatpush3.bf16.msra.mxu0 %v772_v49 }
  0x52   :  { %712 = vmatprep.subr.bf16.mxu0 %v773_v50 }
  0x55   :  { %713 = vmatpush3.bf16.msra.mxu0 %v774_v51 }
  0x56   :  { %714 = vmatprep.subr.bf16.mxu0 %v775_v52 }
  0x59   :  { %715 = vmatpush3.bf16.msra.mxu0 %v776_v53 }
  0x5a   :  { %716 = vmatprep.subr.bf16.mxu0 %v777_v54 }
  0x5d   :  { %717 = vmatpush3.bf16.msra.mxu0 %v778_v58 }
  0x5e   :  { %718 = vmatprep.subr.bf16.mxu0 %v779_v59 }
  0x61   :  { %719 = vmatpush3.bf16.msra.mxu0 %v780_v60 }
  0x62   :  { %720 = vmatprep.subr.bf16.mxu0 %v781_v61 }
  0x65   :  { %721 = vmatpush3.bf16.msra.mxu0 %v782_v62 }
  0x68   :  { %568 = vmatmul.mubr.bf16.vlgmr.msra.gmra.mrb[4].mxu0 %v60_v1 }
 0x11b   :  { %v678_v2 = vpop.f32.mrb[0].mxu0 }
 0x11c   :  { %v679_v4 = vpop.f32.mrb[1].mxu0 }
 0x11d   :  { %v680_v5 = vadd.f32 %v679_v4, %v678_v2  ;;  %v681_v6 = vpop.f32.mrb[2].mxu0  ;;  %v700_v7 = vpop.f32.mrb[0].mxu1 }
 0x11e   :  { %v682_v8 = vpop.f32.mrb[3].mxu0  ;;  %v701_v11 = vpop.f32.mrb[1].mxu1 }
 0x11f   :  { %v488_v9 = vadd.f32 %v680_v5, %v604_v3  ;;  %v683_v10 = vadd.f32 %v682_v8, %v681_v6  ;;  %v702_v12 = vadd.f32 %v701_v11, %v700_v7  ;;  %v703_v13 = vpop.f32.mrb[2].mxu1 }
 0x120   :  { %v704_v15 = vpop.f32.mrb[3].mxu1 }
 0x121   :  { %v491_v14 = vadd.f32 %v683_v10, %v604_v3  ;;  %v529_v16 = vadd.f32 %v702_v12, %v488_v9  ;;  %v705_v17 = vadd.f32 %v704_v15, %v703_v13 }
 0x123   :  { %v532_v18 = vadd.f32 %v705_v17, %v491_v14 }
 0x13b   :  { %v722_v19 = vpop.f32.mrb[4].mxu0 }
 0x13c   :  { %v723_v20 = vpop.f32.mrb[5].mxu0 }
 0x13d   :  { %v724_v21 = vadd.f32 %v723_v20, %v722_v19  ;;  %v725_v22 = vpop.f32.mrb[6].mxu0 }
 0x13e   :  { %v726_v23 = vpop.f32.mrb[7].mxu0 }
 0x13f   :  { %v570_v24 = vadd.f32 %v724_v21, %v529_v16  ;;  %v727_v25 = vadd.f32 %v726_v23, %v725_v22 }
 0x141   :  { %v573_v26 = vadd.f32 %v727_v25, %v532_v18 }
 0x143   :  { %v660_v27 = vpack.c.bf16 %v573_v26, %v570_v24 }
 0x145   :  { %661 = vst [vmem:[#allocation7] sm:$0xff] %v660_v27  }
 0x146   :  { %838 = shalt.err (!%p835_p6)
}
 0x147   :  { %s839_s17 = scalar_lea.hbm %s930_s3, 128 }
 0x148   :  { %p840_p7 = scmp.ne.s32.totalorder %s930_s3, %s839_s17  ;;  %p843_p8 = scmp.lt.u32.totalorder %s839_s17, %s930_s3 }
 0x14a   :  { %p845_p9 = pnand %p843_p8, %p840_p7 }
 0x14c   :  { %848 = shalt.err (!%p845_p9)
}
 0x14d   :  { %597 = dma.vmem_to_hbm [thread:$0]  %s592_s13, 128, %s930_s3, [#allocation4], %s859_s0, %s859_s0, %s860_s9  }
 0x14e   :  { %853 = dma.done.wait [#allocation4], 128  }
 0x14f   :  { %854 = vsyncadd [#allocation4], 4294967168 }
 0x150   :  { %601 = vsyncpa [#allocation3], 1 }
 0x151   :  { %602 = vsyncpa [#allocation6], 1 }
 0x152   :  { %603 = vsyncpa [#allocation4], 1 }

</bundles_post_ra>
